<compile_context>
chip_gen: v5e
topology: v5e:2x2
jax: 0.10.0
libtpu: 0.0.40
codegen_flags: <defaults>
</compile_context>

<pallas_src>
import jax
import jax.numpy as jnp
from jax.experimental import pallas as pl
from jax.experimental.pallas import tpu as pltpu


def actor_kernel(xT_ref, w1_ref, b1_ref, w2_ref, b2_ref, oT_ref):
    # xT_ref: (nS, block_n)   -- batch on lanes
    # w1_ref: (H, nS), b1_ref: (H, 1)
    # w2_ref: (nA, H), b2_ref: (nA, 1)
    # oT_ref: (nA, block_n)   -- lane-dense output tile
    xT = xT_ref[...]

    # Layer 1: Linear(nS -> H) + Tanh   (MXU matmul, f32 accumulation)
    # TODO(synk): if v7x bundle dumps show the EUP slot saturated by this tanh,
    # switch to a bf16 tanh (v6e/v7x EUP supports bf16).
    h = jnp.tanh(
        jnp.dot(w1_ref[...], xT, preferred_element_type=jnp.float32) + b1_ref[...]
    )  # (H, block_n)

    # Layer 2: Linear(H -> nA)
    logits = (
        jnp.dot(w2_ref[...], h, preferred_element_type=jnp.float32) + b2_ref[...]
    )  # (nA, block_n)

    # Stable log-sigmoid:
    #   x >= 0:  log s = -log1p(exp(-x))
    #   x <  0:  log s = x - log1p(exp(x))
    log_s = jnp.where(
        logits >= 0.0,
        -jnp.log1p(jnp.exp(-logits)),
        logits - jnp.log1p(jnp.exp(logits)),
    )
    s = jnp.exp(log_s)                              # = sigmoid(logits), no underflow issue here
    denom = jnp.sum(s, axis=0, keepdims=True)       # normalize over the action axis (sublanes)
    oT_ref[...] = log_s - jnp.log(denom)


def actor_forward(x, w1, b1, w2, b2, *, block_n=512):
    """x: (B, nS) f32. w1: (H, nS), b1: (H, 1), w2: (nA, H), b2: (nA, 1).
    Returns (B, nA) f32 = log(normalized sigmoid(MLP(x)))."""
    B, nS = x.shape
    H = w1.shape[0]
    nA = w2.shape[0]

    LANE = 128
    b_aligned = LANE * pl.cdiv(B, LANE)                       # lane-aligned batch
    bn = max(LANE, (min(block_n, b_aligned) // LANE) * LANE)  # multiple of 128 (256-aligned by default)
    Bp = bn * pl.cdiv(b_aligned, bn)                          # padded batch, multiple of bn

    # Layout plumbing (outside the kernel): batch onto lanes, pad to Bp.
    xT = jnp.pad(x.T, ((0, 0), (0, Bp - B)))                  # (nS, Bp)

    oT = pl.pallas_call(
        actor_kernel,
        out_shape=jax.ShapeDtypeStruct((nA, Bp), jnp.float32),
        grid_spec=pl.GridSpec(
            grid=(Bp // bn,),
            in_specs=[
                pl.BlockSpec((nS, bn), lambda i: (0, i)),   # x^T tile (lane-dense)
                pl.BlockSpec((H, nS), lambda i: (0, 0)),    # W1 (full)
                pl.BlockSpec((H, 1), lambda i: (0, 0)),     # b1 (full)
                pl.BlockSpec((nA, H), lambda i: (0, 0)),    # W2 (full)
                pl.BlockSpec((nA, 1), lambda i: (0, 0)),    # b2 (full)
            ],
            out_specs=pl.BlockSpec((nA, bn), lambda i: (0, i)),  # lane-dense output slab
        ),
        compiler_params=pltpu.CompilerParams(
            dimension_semantics=("parallel",),
        ),
    )(xT, w1, b1, w2, b2)

    return oT[:, :B].T  # (B, nA)


def init_actor_params(key, nS, nA, hidden=50):
    """Deterministic init mimicking PyTorch nn.Linear default (uniform +-1/sqrt(fan_in)),
    stored in PyTorch (out_features, in_features) layout."""
    k1, k2, k3, k4 = jax.random.split(key, 4)
    bound1 = 1.0 / jnp.sqrt(jnp.float32(nS))
    bound2 = 1.0 / jnp.sqrt(jnp.float32(hidden))
    w1 = jax.random.uniform(k1, (hidden, nS), jnp.float32, -bound1, bound1)
    b1 = jax.random.uniform(k2, (hidden, 1), jnp.float32, -bound1, bound1)
    w2 = jax.random.uniform(k3, (nA, hidden), jnp.float32, -bound2, bound2)
    b2 = jax.random.uniform(k4, (nA, 1), jnp.float32, -bound2, bound2)
    return w1, b1, w2, b2


def actor_reference(x, w1, b1, w2, b2):
    """Pure-JAX reference matching the PyTorch forward semantics."""
    h = jnp.tanh(x @ w1.T + b1[:, 0])
    logits = h @ w2.T + b2[:, 0]
    s = jax.nn.sigmoid(logits)
    p = s / jnp.sum(s, axis=-1, keepdims=True)
    return jnp.log(p)


if __name__ == "__main__":
    nS, nA, B = 32, 4, 8
    key = jax.random.PRNGKey(0)
    kx, kp = jax.random.split(key)

    x = jax.random.normal(kx, (B, nS), dtype=jnp.float32)
    w1, b1, w2, b2 = init_actor_params(kp, nS, nA)

    out = actor_forward(x, w1, b1, w2, b2)
    out = jax.block_until_ready(out)

    ref = actor_reference(x, w1, b1, w2, b2)
    assert out.shape == (B, nA)
    assert jnp.allclose(out, ref, atol=1e-5, rtol=1e-5), "mismatch vs reference"

    print("KERNEL_OK")
</pallas_src>

<mosaic_0001>
module attributes {stable_mosaic.version = 11 : i64} {
  func.func @actor_kernel(%arg0: i32, %arg1: memref<32x128xf32, #tpu.memory_space<vmem>>, %arg2: memref<50x32xf32, #tpu.memory_space<vmem>>, %arg3: memref<50x1xf32, #tpu.memory_space<vmem>>, %arg4: memref<4x50xf32, #tpu.memory_space<vmem>>, %arg5: memref<4x1xf32, #tpu.memory_space<vmem>>, %arg6: memref<4x128xf32, #tpu.memory_space<vmem>>) attributes {dimension_semantics = [#tpu.dimension_semantics<parallel>], iteration_bounds = array<i64: 1>, scalar_prefetch = 0 : i64, scratch_operands = 0 : i64, tpu.core_type = #tpu.core_type<tc>, window_params = [{transform_indices = @transform_0, window_bounds = array<i64: 32, 128>}, {pipeline_mode = #tpu.pipeline_mode<synchronous>, transform_indices = @transform_1, window_bounds = array<i64: 50, 32>}, {pipeline_mode = #tpu.pipeline_mode<synchronous>, transform_indices = @transform_2, window_bounds = array<i64: 50, 1>}, {pipeline_mode = #tpu.pipeline_mode<synchronous>, transform_indices = @transform_3, window_bounds = array<i64: 4, 50>}, {pipeline_mode = #tpu.pipeline_mode<synchronous>, transform_indices = @transform_4, window_bounds = array<i64: 4, 1>}, {transform_indices = @transform_5, window_bounds = array<i64: 4, 128>}]} {
    %c0 = arith.constant 0 : index
    %c0_0 = arith.constant 0 : index
    %0 = vector.load %arg1[%c0, %c0_0] : memref<32x128xf32, #tpu.memory_space<vmem>>, vector<32x128xf32>
    %c0_1 = arith.constant 0 : index
    %c0_2 = arith.constant 0 : index
    %1 = vector.load %arg2[%c0_1, %c0_2] : memref<50x32xf32, #tpu.memory_space<vmem>>, vector<50x32xf32>
    %cst = arith.constant dense<0.000000e+00> : vector<50x128xf32>
    %2 = tpu.matmul %1, %0, %cst {dimension_numbers = #tpu.dot_dimension_numbers<[1], [0], [0], [1], [0, 0, 1, 1], [], []>} : vector<50x32xf32>, vector<32x128xf32>, vector<50x128xf32> -> vector<50x128xf32>
    %c0_3 = arith.constant 0 : index
    %c0_4 = arith.constant 0 : index
    %3 = vector.load %arg3[%c0_3, %c0_4] : memref<50x1xf32, #tpu.memory_space<vmem>>, vector<50x1xf32>
    %4 = vector.broadcast %3 : vector<50x1xf32> to vector<50x128xf32>
    %5 = arith.addf %2, %4 : vector<50x128xf32>
    %6 = math.tanh %5 : vector<50x128xf32>
    %c0_5 = arith.constant 0 : index
    %c0_6 = arith.constant 0 : index
    %7 = vector.load %arg4[%c0_5, %c0_6] : memref<4x50xf32, #tpu.memory_space<vmem>>, vector<4x50xf32>
    %cst_7 = arith.constant dense<0.000000e+00> : vector<4x128xf32>
    %8 = tpu.matmul %7, %6, %cst_7 {dimension_numbers = #tpu.dot_dimension_numbers<[1], [0], [0], [1], [0, 0, 1, 1], [], []>} : vector<4x50xf32>, vector<50x128xf32>, vector<4x128xf32> -> vector<4x128xf32>
    %c0_8 = arith.constant 0 : index
    %c0_9 = arith.constant 0 : index
    %9 = vector.load %arg5[%c0_8, %c0_9] : memref<4x1xf32, #tpu.memory_space<vmem>>, vector<4x1xf32>
    %10 = vector.broadcast %9 : vector<4x1xf32> to vector<4x128xf32>
    %11 = arith.addf %8, %10 : vector<4x128xf32>
    %cst_10 = arith.constant 0.000000e+00 : f32
    %12 = vector.broadcast %cst_10 : f32 to vector<4x128xf32>
    %13 = arith.cmpf oge, %11, %12 : vector<4x128xf32>
    %cst_11 = arith.constant 0.000000e+00 : f32
    %14 = vector.broadcast %cst_11 : f32 to vector<4x128xf32>
    %15 = arith.subf %14, %11 : vector<4x128xf32>
    %16 = math.exp %15 : vector<4x128xf32>
    %17 = math.log1p %16 : vector<4x128xf32>
    %cst_12 = arith.constant 0.000000e+00 : f32
    %18 = vector.broadcast %cst_12 : f32 to vector<4x128xf32>
    %19 = arith.subf %18, %17 : vector<4x128xf32>
    %20 = math.exp %11 : vector<4x128xf32>
    %21 = math.log1p %20 : vector<4x128xf32>
    %22 = arith.subf %11, %21 : vector<4x128xf32>
    %23 = arith.select %13, %19, %22 : vector<4x128xi1>, vector<4x128xf32>
    %24 = math.exp %23 : vector<4x128xf32>
    %cst_13 = arith.constant dense<0.000000e+00> : vector<128xf32>
    %25 = vector.multi_reduction <add>, %24, %cst_13 [0] : vector<4x128xf32> to vector<128xf32>
    %26 = vector.shape_cast %25 : vector<128xf32> to vector<1x128xf32>
    %27 = math.log %26 : vector<1x128xf32>
    %28 = vector.broadcast %27 : vector<1x128xf32> to vector<4x128xf32>
    %29 = arith.subf %23, %28 : vector<4x128xf32>
    %c0_14 = arith.constant 0 : index
    %c0_15 = arith.constant 0 : index
    %30 = vector.load %arg6[%c0_14, %c0_15] : memref<4x128xf32, #tpu.memory_space<vmem>>, vector<4x128xf32>
    tpu.vector_store %arg6[%c0_14, %c0_15], %29 {strides = array<i32>} : memref<4x128xf32, #tpu.memory_space<vmem>>, vector<4x128xf32>,
    return
  }
  func.func @transform_0(%arg0: i32) -> (i32, i32) {
    %c0_i32 = arith.constant 0 : i32
    %c0_i32_0 = arith.constant 0 : i32
    return %c0_i32, %arg0 : i32, i32
  }
  func.func @transform_1(%arg0: i32) -> (i32, i32) {
    %c0_i32 = arith.constant 0 : i32
    %c0_i32_0 = arith.constant 0 : i32
    %c0_i32_1 = arith.constant 0 : i32
    return %c0_i32, %c0_i32_0 : i32, i32
  }
  func.func @transform_2(%arg0: i32) -> (i32, i32) {
    %c0_i32 = arith.constant 0 : i32
    %c0_i32_0 = arith.constant 0 : i32
    %c0_i32_1 = arith.constant 0 : i32
    return %c0_i32, %c0_i32_0 : i32, i32
  }
  func.func @transform_3(%arg0: i32) -> (i32, i32) {
    %c0_i32 = arith.constant 0 : i32
    %c0_i32_0 = arith.constant 0 : i32
    %c0_i32_1 = arith.constant 0 : i32
    return %c0_i32, %c0_i32_0 : i32, i32
  }
  func.func @transform_4(%arg0: i32) -> (i32, i32) {
    %c0_i32 = arith.constant 0 : i32
    %c0_i32_0 = arith.constant 0 : i32
    %c0_i32_1 = arith.constant 0 : i32
    return %c0_i32, %c0_i32_0 : i32, i32
  }
  func.func @transform_5(%arg0: i32) -> (i32, i32) {
    %c0_i32 = arith.constant 0 : i32
    %c0_i32_0 = arith.constant 0 : i32
    return %c0_i32, %arg0 : i32, i32
  }
}

</mosaic_0001>

<bundles_post_ra>
// kernel: tpu_custom_call.1
= control target key start
LH: loop header
LB: loop body
LE: loop exit
PB: predicated region body
PF: predicated region fallthrough
CT: control target
= control target key end

     0   :  { %v307_v3 = vmov 0   ;;  %vm74_vm0 = vcmask 261120   ;;  %s409_s0 = inlined_call_operand.vmem [shape: f32[32,128], index: 0, kind: input, shape index: {}]   ;;  %s410_s1 = inlined_call_operand.vmem [shape: f32[50,32], index: 1, kind: input, shape index: {}]   ;;  %s411_s2 = inlined_call_operand.vmem [shape: f32[50,1], index: 2, kind: input, shape index: {}]   ;;  %s412_s3 = inlined_call_operand.vmem [shape: f32[4,50], index: 3, kind: input, shape index: {}]   ;;  %s413_s4 = inlined_call_operand.vmem [shape: f32[4,1], index: 4, kind: input, shape index: {}]   ;;  %s414_s5 = inlined_call_operand.hbm [shape: f32[4,128], index: 5, kind: output, shape index: {}]  }
   0x1   :  { %v24_v0 = vld [vmem:[%s409_s0 + $0x18] sm:$0xff]  ;;  %v23_v1 = vld [vmem:[%s409_s0 + $0x10] sm:$0xff]  ;;  %v22_v2 = vld [vmem:[%s409_s0 + $0x8] sm:$0xff]  ;;  %252 = vset.pattern.permute.xlu0 %v307_v3  ;;  %253 = vset.pattern.permute.xlu1 %v307_v3 }
   0x2   :  { %242 = vmatpush.msra.mxu2 %v24_v0  ;;  %243 = vmatpush.msra.mxu3 %v24_v0  ;;  %v38_v4 = vld [vmem:[%s411_s2 + $0x30] sm:$0x3]  ;;  %v21_v5 = vld [vmem:[%s409_s0] sm:$0xff]  ;;  %v30_v7 = vld [vmem:[%s410_s1 + $0x28] sm:$0xff] }
   0x3   :  { %108 = vmatpush.msra.mxu0 %v24_v0  ;;  %71 = vperm.xlu0 %252, %v38_v4   ;;  %v27_v6 = vld [vmem:[%s410_s1 + $0x10] sm:$0xff]  ;;  %v36_v8 = vld [vmem:[%s411_s2 + $0x20] sm:$0xff] }
   0x4   :  { %244 = vmatpush.msra.mxu2 %v23_v1  ;;  %245 = vmatpush.msra.mxu3 %v23_v1 }
   0x5   :  { %109 = vmatpush.msra.mxu0 %v23_v1 }
   0x6   :  { %246 = vmatpush.msra.mxu2 %v22_v2  ;;  %247 = vmatpush.msra.mxu3 %v22_v2 }
   0x7   :  { %110 = vmatpush.msra.mxu0 %v22_v2 }
   0x8   :  { %10 = vsyncpa [#allocation3], 0  ;;  %248 = vmatpush.msra.mxu2 %v21_v5  ;;  %249 = vmatpush.msra.mxu3 %v21_v5  ;;  %v25_v9 = vld [vmem:[%s410_s1] sm:$0xff]  ;;  %v34_v10 = vld [vmem:[%s411_s2 + $0x10] sm:$0xff]  ;;  %vm152_vm1 = vcmask 1041408   ;;  %vm148_vm2 = vcmask 408576  }
   0x9   :  { %235 = vmatmul.msk.f32.vlgmr.msra.gmra.mxu2 %vm74_vm0, %v27_v6  ;;  %238 = vmatmul.msk.f32.vlgmr.msra.gmra.mxu3 %vm74_vm0, %v30_v7  ;;  %v37_v11 = vld [vmem:[%s411_s2 + $0x28] sm:$0xff]  ;;  %v28_v12 = vld [vmem:[%s410_s1 + $0x18] sm:$0xff]  ;;  %v31_v13 = vld [vmem:[%s410_s1 + $0x30] sm:$0x3]  ;;  %vm205_vm6 = vcmask 1043456   ;;  %s224_s7 = sshll.u32 %s414_s5, 4  ;;  %s225_s7 = int_to_ptr.hbm [resolvable:$true] %s224_s7 }
   0xa   :  { %61 = vperm.xlu1 %253, %v36_v8   ;;  %111 = vmatpush.msra.mxu0 %v21_v5  ;;  %v35_v14 = vld [vmem:[%s411_s2 + $0x18] sm:$0xff]  ;;  %v26_v15 = vld [vmem:[%s410_s1 + $0x8] sm:$0xff]  ;;  %v32_v17 = vld [vmem:[%s411_s2] sm:$0xff] }
   0xb   :  { %233 = vmatmul.msk.f32.vlgmr.msra.gmra.mxu0 %vm74_vm0, %v25_v9  ;;  %254 = vset.pattern.permute.xlu2 %v307_v3  ;;  %v33_v16 = vld [vmem:[%s411_s2 + $0x8] sm:$0xff]  ;;  %v29_v18 = vld [vmem:[%s410_s1 + $0x20] sm:$0xff] }
   0xc   :  { %51 = vperm.xlu2 %254, %v34_v10   ;;  %66 = vperm.xlu0 %252, %v37_v11   ;;  %v142_v19 = vld [vmem:[%s413_s4] sm:$0xf] }
   0xd   :  { %v141_v47 = vld [vmem:[%s412_s3] sm:$0xf]  ;;  %s308_s3 = smov [#allocation2]  }
   0xe   :  { %s222_s4 = sshll.u32 %s308_s3, 4  ;;  %s223_s4 = int_to_ptr.vmem [resolvable:$true] %s222_s4 }
  0x11   :  { %236 = vmatmul.msk.f32.gmra.mxu2 %vm74_vm0, %v28_v12  ;;  %239 = vmatmul.msk.f32.gmra.mxu3 %vm74_vm0, %v31_v13 }
  0x12   :  { %56 = vperm.xlu1 %253, %v35_v14  }
  0x13   :  { %234 = vmatmul.msk.f32.gmra.mxu0 %vm74_vm0, %v26_v15 }
  0x14   :  { %46 = vperm.xlu2 %254, %v33_v16   ;;  %41 = vperm.xlu0 %252, %v32_v17  }
  0x19   :  { %237 = vmatmul.msk.f32.gmra.mxu2 %vm74_vm0, %v29_v18 }
  0x1a   :  { %145 = vperm.xlu1 %253, %v142_v19  }
  0x66   :  { %v52_v29 = vpop.permute.xlu2 %51 }
  0x6e   :  { %v47_v36 = vpop.permute.xlu2 %46 }
  0x75   :  { %v72_v20 = vpop.permute.xlu0 %71 }
  0x7c   :  { %v62_v23 = vpop.permute.xlu1 %61 }
  0x7e   :  { %v67_v27 = vpop.permute.xlu0 %66 }
  0x84   :  { %v57_v31 = vpop.permute.xlu1 %56 }
  0x86   :  { %v42_v40 = vpop.permute.xlu0 %41 }
  0x88   :  { %v113_v24 = vpop.f32.mrf.mxu0 }
  0x89   :  { %v114_v42 = vadd.f32 %v113_v24, %v42_v40 }
  0x8c   :  { %v119_v21 = vpop.f32.mrf.mxu2  ;;  %v128_v22 = vpop.f32.mrf.mxu3 }
  0x8d   :  { %v129_v30 = vadd.f32 %v128_v22, %v67_v27  ;;  %v120_v38 = vadd.f32 %v119_v21, %v52_v29  ;;  %v146_v49 = vpop.permute.xlu1 %145 }
  0x90   :  { %v116_v37 = vpop.f32.mrf.mxu0 }
  0x91   :  { %v117_v41 = vadd.f32 %v116_v37, %v47_v36 }
  0x94   :  { %v122_v25 = vpop.f32.mrf.mxu2  ;;  %v131_v26 = vpop.f32.mrf.mxu3 }
  0x95   :  { %v132_v28 = vadd.f32 %v131_v26, %v72_v20  ;;  %v123_v33 = vadd.f32 %v122_v25, %v57_v31 }
  0x97   :  { %255 = vtanh.f32 %v132_v28 }
  0x98   :  { %257 = vtanh.f32 %v129_v30 }
  0x9c   :  { %v125_v32 = vpop.f32.mrf.mxu2 }
  0x9d   :  { %v126_v34 = vadd.f32 %v125_v32, %v62_v23  ;;  %v256_v35 = vpop.eup %255 }
  0x9e   :  { %240 = vmatpush.msk.msra.mxu1 %vm152_vm1, %v256_v35  ;;  %v258_v39 = vpop.eup %257 }
  0x9f   :  { %259 = vtanh.f32 %v126_v34 }
  0xa0   :  { %261 = vtanh.f32 %v123_v33  ;;  %166 = vmatpush.msra.mxu1 %v258_v39 }
  0xa1   :  { %263 = vtanh.f32 %v120_v38 }
  0xa2   :  { %265 = vtanh.f32 %v117_v41 }
  0xa3   :  { %267 = vtanh.f32 %v114_v42 }
  0xa5   :  { %v260_v43 = vpop.eup %259 }
  0xa6   :  { %167 = vmatpush.msra.mxu1 %v260_v43  ;;  %v262_v44 = vpop.eup %261 }
  0xa7   :  { %v264_v45 = vpop.eup %263 }
  0xa8   :  { %168 = vmatpush.msra.mxu1 %v262_v44  ;;  %v266_v46 = vpop.eup %265 }
  0xa9   :  { %v268_v48 = vpop.eup %267 }
  0xaa   :  { %169 = vmatpush.msra.mxu1 %v264_v45 }
  0xac   :  { %170 = vmatpush.msra.mxu1 %v266_v46 }
  0xae   :  { %171 = vmatpush.msra.mxu1 %v268_v48 }
  0xaf   :  { %241 = vmatmul.msk.f32.vlgmr.msra.gmra.mxu1 %vm148_vm2, %v141_v47 }
 0x12c   :  { %v173_v50 = vpop.f32.mrf.mxu1 }
 0x12d   :  { %v174_v51 = vadd.f32 %v173_v50, %v146_v49 }
 0x12f   :  { %v177_v52 = vsub.f32 0.0, %v174_v51  ;;  %v190_v53 = vmul.f32 1.442695, %v174_v51  ;;  %vm176_vm5 = vcmp.ge.f32.partialorder %v174_v51, 0.0 }
 0x131   :  { %v178_v54 = vmul.f32 1.442695, %v177_v52  ;;  %269 = vpow2.f32 %v190_v53 }
 0x133   :  { %271 = vpow2.f32 %v178_v54 }
 0x137   :  { %v270_v55 = vpop.eup %269 }
 0x138   :  { %v192_v56 = vadd.f32 1.0, %v270_v55  ;;  %v195_v58 = vmul.f32 -0.5, %v270_v55  ;;  %v198_v62 = vand.u32 2147483647, %v270_v55 }
 0x139   :  { %v272_v57 = vpop.eup %271 }
 0x13a   :  { %273 = vlog2.f32 %v192_v56  ;;  %v180_v59 = vadd.f32 1.0, %v272_v57  ;;  %v183_v60 = vmul.f32 -0.5, %v272_v57  ;;  %v196_v61 = vadd.f32 1.0, %v195_v58 }
 0x13b   :  { %v186_v1 = vand.u32 2147483647, %v272_v57  ;;  %vm199_vm3 = vcmp.lt.f32.partialorder %v198_v62, 0.0004427343 }
 0x13c   :  { %275 = vlog2.f32 %v180_v59  ;;  %v184_v63 = vadd.f32 1.0, %v183_v60  ;;  %v197_v3 = vmul.f32 %v270_v55, %v196_v61 }
 0x13d   :  { %vm187_vm4 = vcmp.lt.f32.partialorder %v186_v1, 0.0004427343 }
 0x13e   :  { %v185_v7 = vmul.f32 %v272_v57, %v184_v63 }
 0x140   :  { %v274_v0 = vpop.eup %273 }
 0x141   :  { %v194_v2 = vmul.f32 0.6931472, %v274_v0 }
 0x142   :  { %v276_v4 = vpop.eup %275 }
 0x143   :  { %v200_v5 = vsel %vm199_vm3, %v197_v3, %v194_v2  ;;  %v182_v6 = vmul.f32 0.6931472, %v276_v4 }
 0x144   :  { %v201_v9 = vsub.f32 %v174_v51, %v200_v5 }
 0x145   :  { %v188_v8 = vsel %vm187_vm4, %v185_v7, %v182_v6 }
 0x146   :  { %v189_v10 = vsub.f32 0.0, %v188_v8 }
 0x148   :  { %v202_v11 = vsel %vm176_vm5, %v189_v10, %v201_v9 }
 0x149   :  { %v203_v12 = vmul.f32 1.442695, %v202_v11 }
 0x14b   :  { %277 = vpow2.f32 %v203_v12 }
 0x151   :  { %v278_v13 = vpop.eup %277 }
 0x152   :  { %v206_v14 = vsel %vm205_vm6, %v278_v13, 0.0 }
 0x153   :  { %v207_v15 = vrot.slane %v206_v14, 4 }
 0x155   :  { %v208_v16 = vadd.f32 %v207_v15, %v206_v14 }
 0x157   :  { %v209_v17 = vrot.slane %v208_v16, 2 }
 0x159   :  { %v210_v18 = vadd.f32 %v209_v17, %v208_v16 }
 0x15b   :  { %v211_v19 = vrot.slane %v210_v18, 1 }
 0x15d   :  { %v212_v20 = vadd.f32 %v211_v19, %v210_v18 }
 0x15f   :  { %279 = vlog2.f32 %v212_v20 }
 0x165   :  { %v280_v21 = vpop.eup %279 }
 0x166   :  { %v214_v22 = vmul.f32 0.6931472, %v280_v21 }
 0x168   :  { %v215_v23 = vsub.f32 %v202_v11, %v214_v22 }
 0x16a   :  { %216 = vst [vmem:[#allocation2] sm:$0xf] %v215_v23 }
 0x16b   :  { %227 = dma.vmem_to_hbm [thread:$0]  %s223_s4, 64, %s225_s7, [#allocation3]  }
 0x16c   :  { %305 = dma.done.wait [#allocation3], 64  }
 0x16d   :  { %306 = vsyncadd [#allocation3], 4294967232 }
 0x16e   :  { %232 = vsyncpa [#allocation3], 1 }

</bundles_post_ra>
